<compile_context>
chip_gen: v7x
topology: tpu7x:2x2x1
jax: 0.10.0
libtpu: 0.0.40
codegen_flags: <defaults>
</compile_context>

<pallas_src>
import jax
import jax.numpy as jnp
from jax import lax
from jax.experimental import pallas as pl
from jax.experimental.pallas import tpu as pltpu

_LANE = 128
_VMEM_BUDGET = 10 * 1024 * 1024  # bytes: double-buffered inputs + f32 temporaries


def _round_up(x, m):
    return ((x + m - 1) // m) * m


def _wce_kernel(logits_ref, target_ref, weights_ref, out_ref):
    # logits_ref / target_ref: (C, T)  -- classes on sublanes, anchors on lanes
    # weights_ref / out_ref:   (1, T)  -- lane-dense
    logits = logits_ref[...].astype(jnp.float32)
    target = target_ref[...].astype(jnp.float32)
    w = weights_ref[...].astype(jnp.float32)

    num_classes = logits.shape[0]

    # Numerically-stable log-sum-exp over the class (sublane) axis.
    m = jnp.max(logits, axis=0, keepdims=True)
    lse = m + jnp.log(jnp.sum(jnp.exp(logits - m), axis=0, keepdims=True))

    # argmax(target, classes) with first-index tie-break (torch.argmax).
    # Kept general (soft / tied targets); for strict one-hot targets this could
    # be replaced by sum(target * logits), but semantics would change otherwise.
    iota = lax.broadcasted_iota(jnp.int32, target.shape, 0)
    tmax = jnp.max(target, axis=0, keepdims=True)
    cand = jnp.where(target >= tmax, iota, num_classes)   # sentinel for non-max
    idx = jnp.min(cand, axis=0, keepdims=True)            # first max index

    # Gather the logit at the target class via a one-hot select (no xlane moves
    # beyond the cheap C-sublane reductions above).
    picked = jnp.sum(jnp.where(iota == idx, logits, 0.0), axis=0, keepdims=True)

    out_ref[...] = (lse - picked) * w


def weighted_cross_entropy_loss(logits, target, weights, *, tile_anchors=None):
    """logits/target: (B, A, C); weights: (B, A) -> (B, A) float32 loss."""
    B, A, C = logits.shape
    N = B * A

    # Lane-dense re-layout: anchors -> lanes, classes -> sublanes.  Native dtype
    # is kept at the DMA boundary; the kernel casts to f32 internally.
    logits_t = logits.reshape(N, C).T          # (C, N)
    target_t = target.reshape(N, C).T          # (C, N)
    weights_r = weights.reshape(1, N)          # (1, N)

    n128 = _round_up(N, _LANE)

    if tile_anchors is None:
        cs = _round_up(C, 8)                   # sublane-padded class count
        in_itemsize = max(jnp.dtype(logits.dtype).itemsize,
                          jnp.dtype(target.dtype).itemsize)
        # Per lane-column: 2 inputs x 2 pipeline buffers in native dtype,
        # ~6 f32 full-size kernel temporaries, plus weights/out double buffers.
        per_lane_bytes = (2 * 2 * in_itemsize + 6 * 4) * cs + 4 * 4
        tile = max(_LANE, (_VMEM_BUDGET // per_lane_bytes) // _LANE * _LANE)
        # Prefer >= 2 grid steps so v7x can shard the parallel axis over 2 TCs
        # (also enables input-prefetch overlap for the auto pipeline).
        if n128 >= 2 * _LANE:
            tile = min(tile, max(_LANE, (n128 // 2) // _LANE * _LANE))
    else:
        tile = max(_LANE, _round_up(tile_anchors, _LANE))
    tile = min(tile, n128)

    n_pad = pl.cdiv(n128, tile) * tile
    grid = n_pad // tile

    pad = n_pad - N
    if pad:
        logits_t = jnp.pad(logits_t, ((0, 0), (0, pad)))
        target_t = jnp.pad(target_t, ((0, 0), (0, pad)))
        weights_r = jnp.pad(weights_r, ((0, 0), (0, pad)))

    out = pl.pallas_call(
        _wce_kernel,
        out_shape=jax.ShapeDtypeStruct((1, n_pad), jnp.float32),
        grid_spec=pltpu.PrefetchScalarGridSpec(
            num_scalar_prefetch=0,
            grid=(grid,),
            in_specs=[
                pl.BlockSpec((C, tile), lambda i: (0, i)),
                pl.BlockSpec((C, tile), lambda i: (0, i)),
                pl.BlockSpec((1, tile), lambda i: (0, i)),
            ],
            out_specs=pl.BlockSpec((1, tile), lambda i: (0, i)),
        ),
        compiler_params=pltpu.CompilerParams(
            dimension_semantics=("parallel",),
        ),
    )(logits_t, target_t, weights_r)

    return out[0, :N].reshape(B, A)


def _reference(logits, target, weights):
    logits = logits.astype(jnp.float32)
    tgt = jnp.argmax(target, axis=-1)
    logp = jax.nn.log_softmax(logits, axis=-1)
    nll = -jnp.take_along_axis(logp, tgt[..., None], axis=-1)[..., 0]
    return nll * weights.astype(jnp.float32)


if __name__ == "__main__":
    key = jax.random.PRNGKey(0)

    # Case 1: shapes from the original demo (B=2, anchors=16, classes=4).
    B, A, C = 2, 16, 4
    k1, k2, k3, k4 = jax.random.split(key, 4)
    logits = jax.random.normal(k1, (B, A, C), dtype=jnp.float32)
    cls = jax.random.randint(k2, (B, A), 0, C)
    target = jax.nn.one_hot(cls, C, dtype=jnp.float32)
    weights = jax.random.uniform(k3, (B, A), dtype=jnp.float32)

    loss = jax.block_until_ready(weighted_cross_entropy_loss(logits, target, weights))
    ref = _reference(logits, target, weights)
    assert loss.shape == (B, A)
    assert jnp.allclose(loss, ref, atol=1e-5, rtol=1e-5)

    # Case 2: ragged anchor count and odd class count (exercises lane padding).
    B2, A2, C2 = 2, 50, 7
    k5, k6, k7, k8 = jax.random.split(k4, 4)
    logits2 = jax.random.normal(k5, (B2, A2, C2), dtype=jnp.float32)
    cls2 = jax.random.randint(k6, (B2, A2), 0, C2)
    target2 = jax.nn.one_hot(cls2, C2, dtype=jnp.float32)
    weights2 = jax.random.uniform(k7, (B2, A2), dtype=jnp.float32)

    loss2 = jax.block_until_ready(
        weighted_cross_entropy_loss(logits2, target2, weights2))
    ref2 = _reference(logits2, target2, weights2)
    assert loss2.shape == (B2, A2)
    assert jnp.allclose(loss2, ref2, atol=1e-5, rtol=1e-5)

    # Case 3: bf16 inputs (exercises native-dtype DMA + in-kernel f32 cast).
    k9, k10, k11 = jax.random.split(k8, 3)
    logits3 = jax.random.normal(k9, (B, A, C), dtype=jnp.float32).astype(jnp.bfloat16)
    cls3 = jax.random.randint(k10, (B, A), 0, C)
    target3 = jax.nn.one_hot(cls3, C, dtype=jnp.bfloat16)
    weights3 = jax.random.uniform(k11, (B, A), dtype=jnp.float32).astype(jnp.bfloat16)

    loss3 = jax.block_until_ready(
        weighted_cross_entropy_loss(logits3, target3, weights3))
    ref3 = _reference(logits3, target3, weights3)
    assert loss3.shape == (B, A)
    assert jnp.allclose(loss3, ref3, atol=1e-4, rtol=1e-4)

    print("KERNEL_OK")
</pallas_src>

<mosaic_0001>
module attributes {stable_mosaic.version = 11 : i64} {
  func.func @_wce_kernel(%arg0: i32, %arg1: memref<4x128xf32, #tpu.memory_space<vmem>>, %arg2: memref<4x128xf32, #tpu.memory_space<vmem>>, %arg3: memref<1x128xf32, #tpu.memory_space<vmem>>, %arg4: memref<1x128xf32, #tpu.memory_space<vmem>>) attributes {dimension_semantics = [#tpu.dimension_semantics<parallel>], iteration_bounds = array<i64: 1>, scalar_prefetch = 0 : i64, scratch_operands = 0 : i64, tpu.core_type = #tpu.core_type<tc>, window_params = [{transform_indices = @transform_0, window_bounds = array<i64: 4, 128>}, {transform_indices = @transform_1, window_bounds = array<i64: 4, 128>}, {transform_indices = @transform_2, window_bounds = array<i64: 1, 128>}, {transform_indices = @transform_3, window_bounds = array<i64: 1, 128>}]} {
    %c0 = arith.constant 0 : index
    %c0_0 = arith.constant 0 : index
    %0 = vector.load %arg1[%c0, %c0_0] : memref<4x128xf32, #tpu.memory_space<vmem>>, vector<4x128xf32>
    %c0_1 = arith.constant 0 : index
    %c0_2 = arith.constant 0 : index
    %1 = vector.load %arg2[%c0_1, %c0_2] : memref<4x128xf32, #tpu.memory_space<vmem>>, vector<4x128xf32>
    %c0_3 = arith.constant 0 : index
    %c0_4 = arith.constant 0 : index
    %2 = vector.load %arg3[%c0_3, %c0_4] : memref<1x128xf32, #tpu.memory_space<vmem>>, vector<1x128xf32>
    %cst = arith.constant dense<0xFF800000> : vector<128xf32>
    %3 = vector.multi_reduction <maximumf>, %0, %cst [0] : vector<4x128xf32> to vector<128xf32>
    %4 = vector.shape_cast %3 : vector<128xf32> to vector<1x128xf32>
    %5 = vector.broadcast %4 : vector<1x128xf32> to vector<4x128xf32>
    %6 = arith.subf %0, %5 : vector<4x128xf32>
    %7 = math.exp %6 : vector<4x128xf32>
    %cst_5 = arith.constant dense<0.000000e+00> : vector<128xf32>
    %8 = vector.multi_reduction <add>, %7, %cst_5 [0] : vector<4x128xf32> to vector<128xf32>
    %9 = vector.shape_cast %8 : vector<128xf32> to vector<1x128xf32>
    %10 = math.log %9 : vector<1x128xf32>
    %11 = arith.addf %4, %10 : vector<1x128xf32>
    %12 = tpu.iota {dimensions = array<i32: 0>} : vector<4x128xi32>
    %cst_6 = arith.constant dense<0xFF800000> : vector<128xf32>
    %13 = vector.multi_reduction <maximumf>, %1, %cst_6 [0] : vector<4x128xf32> to vector<128xf32>
    %14 = vector.shape_cast %13 : vector<128xf32> to vector<1x128xf32>
    %15 = vector.broadcast %14 : vector<1x128xf32> to vector<4x128xf32>
    %16 = arith.cmpf oge, %1, %15 : vector<4x128xf32>
    %c4_i32 = arith.constant 4 : i32
    %17 = vector.broadcast %c4_i32 : i32 to vector<4x128xi32>
    %18 = arith.select %16, %12, %17 : vector<4x128xi1>, vector<4x128xi32>
    %cst_7 = arith.constant dense<2147483647> : vector<128xi32>
    %19 = vector.multi_reduction <minsi>, %18, %cst_7 [0] : vector<4x128xi32> to vector<128xi32>
    %20 = vector.shape_cast %19 : vector<128xi32> to vector<1x128xi32>
    %21 = vector.broadcast %20 : vector<1x128xi32> to vector<4x128xi32>
    %22 = arith.cmpi eq, %12, %21 : vector<4x128xi32>
    %cst_8 = arith.constant 0.000000e+00 : f32
    %23 = vector.broadcast %cst_8 : f32 to vector<4x128xf32>
    %24 = arith.select %22, %0, %23 : vector<4x128xi1>, vector<4x128xf32>
    %cst_9 = arith.constant dense<0.000000e+00> : vector<128xf32>
    %25 = vector.multi_reduction <add>, %24, %cst_9 [0] : vector<4x128xf32> to vector<128xf32>
    %26 = vector.shape_cast %25 : vector<128xf32> to vector<1x128xf32>
    %27 = arith.subf %11, %26 : vector<1x128xf32>
    %28 = arith.mulf %27, %2 : vector<1x128xf32>
    %c0_10 = arith.constant 0 : index
    %c0_11 = arith.constant 0 : index
    %29 = vector.load %arg4[%c0_10, %c0_11] : memref<1x128xf32, #tpu.memory_space<vmem>>, vector<1x128xf32>
    tpu.vector_store %arg4[%c0_10, %c0_11], %28 {strides = array<i32>} : memref<1x128xf32, #tpu.memory_space<vmem>>, vector<1x128xf32>,
    return
  }
  func.func @transform_0(%arg0: i32) -> (i32, i32) {
    %c0_i32 = arith.constant 0 : i32
    %c0_i32_0 = arith.constant 0 : i32
    return %c0_i32, %arg0 : i32, i32
  }
  func.func @transform_1(%arg0: i32) -> (i32, i32) {
    %c0_i32 = arith.constant 0 : i32
    %c0_i32_0 = arith.constant 0 : i32
    return %c0_i32, %arg0 : i32, i32
  }
  func.func @transform_2(%arg0: i32) -> (i32, i32) {
    %c0_i32 = arith.constant 0 : i32
    %c0_i32_0 = arith.constant 0 : i32
    return %c0_i32, %arg0 : i32, i32
  }
  func.func @transform_3(%arg0: i32) -> (i32, i32) {
    %c0_i32 = arith.constant 0 : i32
    %c0_i32_0 = arith.constant 0 : i32
    return %c0_i32, %arg0 : i32, i32
  }
}

</mosaic_0001>

<bundles_post_ra>
// kernel: tpu_custom_call.1
= control target key start
LH: loop header
LB: loop body
LE: loop exit
PB: predicated region body
PF: predicated region fallthrough
CT: control target
= control target key end

     0   :  { %8 = vsyncpa [#allocation3], 0  ;;  %s258_s0 = inlined_call_operand.hbm [shape: f32[4,128], index: 0, kind: input, shape index: {}]   ;;  %s259_s1 = inlined_call_operand.hbm [shape: f32[4,128], index: 1, kind: input, shape index: {}]   ;;  %s260_s2 = inlined_call_operand.vmem [shape: f32[1,128], index: 2, kind: input, shape index: {}]   ;;  %s261_s3 = inlined_call_operand.hbm [shape: f32[1,128], index: 3, kind: output, shape index: {}]  }
   0x1   :  { %9 = vsyncpa [#allocation6], 0 }
   0x2   :  { %10 = vsyncpa [#allocation4], 0  ;;  %s191_s12 = smov [#allocation2]   ;;  %s192_s14 = smov [#allocation5]  }
   0x3   :  { %s17_s13 = sshll.u32 %s191_s12, 4  ;;  %s27_s15 = sshll.u32 %s192_s14, 4  ;;  %s18_s13 = int_to_ptr.vmem [resolvable:$true] %s17_s13  ;;  %s28_s15 = int_to_ptr.vmem [resolvable:$true] %s27_s15 }
   0x4   :  { %s119_s18 = scalar_lea.hbm %s258_s0, 64 }
   0x5   :  { %p120_p0 = scmp.ne.s32.totalorder %s258_s0, %s119_s18  ;;  %p123_p1 = scmp.lt.u32.totalorder %s119_s18, %s258_s0 }
   0x7   :  { %p125_p2 = pnand %p123_p1, %p120_p0 }
   0x9   :  { %128 = shalt.err (!%p125_p2)
}
   0xa   :  { %s129_s23 = scalar_lea.vmem %s18_s13, 64  ;;  %p134_p4 = scmp.lt.s32.totalorder %s18_s13, %s18_s13 }
   0xb   :  { %p130_p3 = scmp.ne.s32.totalorder %s18_s13, %s129_s23  ;;  %p135_p5 = scmp.lt.s32.totalorder %s129_s23, %s129_s23 }
   0xd   :  { %p136_p6 = por %p135_p5, %p134_p4 }
   0xf   :  { %p137_p7 = pnand %p136_p6, %p130_p3 }
  0x11   :  { %140 = shalt.err (!%p137_p7)
}
  0x12   :  { %20 = dma.hbm_to_vmem [thread:$0]  %s258_s0, 64, %s18_s13, [#allocation3]  }
  0x13   :  { %s141_s28 = scalar_lea.hbm %s259_s1, 64 }
  0x14   :  { %p142_p8 = scmp.ne.s32.totalorder %s259_s1, %s141_s28  ;;  %p145_p9 = scmp.lt.u32.totalorder %s141_s28, %s259_s1 }
  0x16   :  { %p147_p10 = pnand %p145_p9, %p142_p8 }
  0x18   :  { %150 = shalt.err (!%p147_p10)
}
  0x19   :  { %s151_s6 = scalar_lea.vmem %s28_s15, 64  ;;  %p156_p12 = scmp.lt.s32.totalorder %s28_s15, %s28_s15 }
  0x1a   :  { %p152_p11 = scmp.ne.s32.totalorder %s28_s15, %s151_s6  ;;  %p157_p13 = scmp.lt.s32.totalorder %s151_s6, %s151_s6 }
  0x1c   :  { %p158_p0 = por %p157_p13, %p156_p12 }
  0x1e   :  { %p159_p1 = pnand %p158_p0, %p152_p11 }
  0x20   :  { %162 = shalt.err (!%p159_p1)
}
  0x21   :  { %30 = dma.hbm_to_vmem [thread:$0]  %s259_s1, 64, %s28_s15, [#allocation6]  }
  0x22   :  { %185 = dma.done.wait [#allocation3], 64  }
  0x23   :  { %186 = vsyncadd [#allocation3], 4294967232 }
  0x24   :  { %187 = dma.done.wait [#allocation6], 64  }
  0x25   :  { %188 = vsyncadd [#allocation6], 4294967232  ;;  %vm42_vm0 = vcmask 1043456   ;;  %v39_v0 = vld [vmem:[#allocation2] sm:$0xf]  ;;  %v63_v10 = vlaneseq  ;;  %s193_s9 = smov [#allocation7]  }
  0x26   :  { %v40_v1 = vld [vmem:[#allocation5] sm:$0xf]  ;;  %v43_v2 = vsel %vm42_vm0, %v39_v0, -inf  ;;  %v41_v47 = vld [vmem:[%s260_s2] sm:$0x1]  ;;  %s102_s10 = sshll.u32 %s193_s9, 4  ;;  %s103_s10 = int_to_ptr.vmem [resolvable:$true] %s102_s10 }
  0x27   :  { %v65_v3 = vsel %vm42_vm0, %v40_v1, -inf  ;;  %v44_v4 = vrot.slane %v43_v2, 4  ;;  %v64_v15 = vshrl.u32 %v63_v10, 7  ;;  %s163_s11 = scalar_lea.vmem %s103_s10, 16  ;;  %s167_s12 = scalar_lea.vmem %s103_s10, 32 }
  0x28   :  { %v66_v5 = vrot.slane %v65_v3, 4  ;;  %p164_p2 = scmp.ne.s32.totalorder %s103_s10, %s163_s11  ;;  %p168_p3 = scmp.lt.s32.totalorder %s103_s10, %s103_s10 }
  0x29   :  { %v45_v6 = vmax.f32 %v43_v2, %v44_v4  ;;  %p169_p4 = scmp.lt.s32.totalorder %s167_s12, %s163_s11 }
  0x2a   :  { %v67_v7 = vmax.f32 %v65_v3, %v66_v5 }
  0x2b   :  { %v46_v8 = vrot.slane %v45_v6, 2  ;;  %p170_p5 = por %p169_p4, %p168_p3 }
  0x2c   :  { %v68_v9 = vrot.slane %v67_v7, 2 }
  0x2d   :  { %v47_v11 = vmax.f32 %v45_v6, %v46_v8  ;;  %p171_p6 = pnand %p170_p5, %p164_p2 }
  0x2e   :  { %v69_v12 = vmax.f32 %v67_v7, %v68_v9 }
  0x2f   :  { %v48_v13 = vrot.slane %v47_v11, 1 }
  0x30   :  { %v70_v14 = vrot.slane %v69_v12, 1 }
  0x31   :  { %v49_v16 = vmax.f32 %v47_v11, %v48_v13 }
  0x32   :  { %v71_v17 = vmax.f32 %v69_v12, %v70_v14 }
  0x33   :  { %v50_v18 = vsub.f32 %v39_v0, %v49_v16 }
  0x34   :  { %vm72_vm1 = vcmp.ge.f32.partialorder %v40_v1, %v71_v17 }
  0x35   :  { %v73_v19 = vsel %vm72_vm1, %v64_v15, 4  ;;  %v51_v20 = vmul.f32 1.442695, %v50_v18 }
  0x36   :  { %v74_v21 = vsel %vm42_vm0, %v73_v19, 2147483647 }
  0x37   :  { %v75_v22 = vrot.slane %v74_v21, 4  ;;  %115 = vpow2.f32 %v51_v20 }
  0x39   :  { %vm76_vm2 = vcmp.lt.s32.totalorder %v74_v21, %v75_v22 }
  0x3a   :  { %v77_v23 = vsel %vm76_vm2, %v74_v21, %v75_v22 }
  0x3b   :  { %v78_v24 = vrot.slane %v77_v23, 2 }
  0x3d   :  { %vm79_vm3 = vcmp.lt.s32.totalorder %v77_v23, %v78_v24 }
  0x3e   :  { %v80_v25 = vsel %vm79_vm3, %v77_v23, %v78_v24 }
  0x3f   :  { %v81_v26 = vrot.slane %v80_v25, 1 }
  0x41   :  { %vm82_vm4 = vcmp.lt.s32.totalorder %v80_v25, %v81_v26  ;;  %v116_v27 = vpop.eup %115 }
  0x42   :  { %v83_v28 = vsel %vm82_vm4, %v80_v25, %v81_v26  ;;  %v53_v29 = vsel %vm42_vm0, %v116_v27, 0.0 }
  0x43   :  { %vm84_vm5 = vcmp.eq.s32.totalorder %v64_v15, %v83_v28  ;;  %v54_v30 = vrot.slane %v53_v29, 4 }
  0x44   :  { %v85_v31 = vsel %vm84_vm5, %v39_v0, 0.0 }
  0x45   :  { %v86_v32 = vsel %vm42_vm0, %v85_v31, 0.0  ;;  %v55_v33 = vadd.f32 %v54_v30, %v53_v29 }
  0x46   :  { %v87_v34 = vrot.slane %v86_v32, 4 }
  0x47   :  { %v56_v35 = vrot.slane %v55_v33, 2 }
  0x48   :  { %v88_v37 = vadd.f32 %v87_v34, %v86_v32 }
  0x49   :  { %v57_v36 = vadd.f32 %v56_v35, %v55_v33 }
  0x4a   :  { %v89_v40 = vrot.slane %v88_v37, 2 }
  0x4b   :  { %v58_v38 = vrot.slane %v57_v36, 1 }
  0x4c   :  { %v90_v41 = vadd.f32 %v89_v40, %v88_v37 }
  0x4d   :  { %v59_v39 = vadd.f32 %v58_v38, %v57_v36 }
  0x4e   :  { %v91_v42 = vrot.slane %v90_v41, 1 }
  0x4f   :  { %117 = vlog2.f32 %v59_v39 }
  0x50   :  { %v92_v45 = vadd.f32 %v91_v42, %v90_v41 }
  0x59   :  { %v118_v43 = vpop.eup %117 }
  0x5a   :  { %v61_v44 = vmul.f32 0.6931472, %v118_v43 }
  0x5c   :  { %v62_v46 = vadd.f32 %v61_v44, %v49_v16 }
  0x5e   :  { %v93_v48 = vsub.f32 %v62_v46, %v92_v45 }
  0x60   :  { %v94_v49 = vmul.f32 %v93_v48, %v41_v47 }
  0x62   :  { %95 = vst [vmem:[#allocation7] sm:$0x1] %v94_v49 }
  0x63   :  { %174 = shalt.err (!%p171_p6)
}
  0x64   :  { %s175_s15 = scalar_lea.hbm %s261_s3, 16 }
  0x65   :  { %p176_p7 = scmp.ne.s32.totalorder %s261_s3, %s175_s15  ;;  %p179_p8 = scmp.lt.u32.totalorder %s175_s15, %s261_s3 }
  0x67   :  { %p181_p9 = pnand %p179_p8, %p176_p7 }
  0x69   :  { %184 = shalt.err (!%p181_p9)
}
  0x6a   :  { %105 = dma.vmem_to_hbm [thread:$0]  %s103_s10, 16, %s261_s3, [#allocation4]  }
  0x6b   :  { %189 = dma.done.wait [#allocation4], 16  }
  0x6c   :  { %190 = vsyncadd [#allocation4], 4294967280 }
  0x6d   :  { %109 = vsyncpa [#allocation3], 1 }
  0x6e   :  { %110 = vsyncpa [#allocation6], 1 }
  0x6f   :  { %111 = vsyncpa [#allocation4], 1 }

</bundles_post_ra>
